<compile_context>
chip_gen: v7x
topology: tpu7x:2x2x1
jax: 0.10.0
libtpu: 0.0.40
codegen_flags: <defaults>
</compile_context>

<pallas_src>
import functools

import jax
import jax.numpy as jnp
from jax import lax
from jax.experimental import pallas as pl
from jax.experimental.pallas import tpu as pltpu

_LN_EPS = 1e-5
_GELU_C = 0.7978845608028654  # sqrt(2/pi)


def _gelu_tanh(x):
    # PyTorch nn.GELU(approximate='tanh')
    return 0.5 * x * (1.0 + jnp.tanh(_GELU_C * (x + 0.044715 * x * x * x)))


def _layernorm(x, gamma, beta):
    mu = jnp.mean(x, axis=-1, keepdims=True)
    xc = x - mu
    var = jnp.mean(xc * xc, axis=-1, keepdims=True)
    return xc * lax.rsqrt(var + _LN_EPS) * gamma + beta


def _round_up(n, m):
    return (n + m - 1) // m * m


# ---------------------------------------------------------------------------
# Fused ln_1 + causal self-attention + c_proj + residual (one grid step per
# batch element; the full (T, E) sequence is VMEM-resident per step).
# ---------------------------------------------------------------------------
def _attn_kernel(x_ref, g1_ref, b1_ref, wqkv_ref, bqkv_ref, wo_ref, bo_ref,
                 o_ref, *, n_head):
    x = x_ref[...].astype(jnp.float32)                       # (T, E)
    T, E = x.shape
    xn = _layernorm(x, g1_ref[...].astype(jnp.float32),
                    b1_ref[...].astype(jnp.float32))

    qkv = jnp.dot(xn.astype(wqkv_ref.dtype), wqkv_ref[...],
                  preferred_element_type=jnp.float32)
    qkv = qkv + bqkv_ref[...].astype(jnp.float32)            # (T, 3E)
    q, k, v = qkv[:, :E], qkv[:, E:2 * E], qkv[:, 2 * E:]

    hd = E // n_head
    scale = 1.0 / (E ** 0.5)            # PyTorch divides by n_embd ** 0.5
    row = lax.broadcasted_iota(jnp.int32, (T, T), 0)
    col = lax.broadcasted_iota(jnp.int32, (T, T), 1)
    causal = col <= row

    heads = []
    for h in range(n_head):              # n_head is static; loop traced once
        qh = q[:, h * hd:(h + 1) * hd]
        kh = k[:, h * hd:(h + 1) * hd]
        vh = v[:, h * hd:(h + 1) * hd]
        s = jnp.dot(qh, kh.T, preferred_element_type=jnp.float32) * scale
        s = jnp.where(causal, s, jnp.float32(-1e30))
        s = s - jnp.max(s, axis=-1, keepdims=True)
        p = jnp.exp(s)
        p = p / jnp.sum(p, axis=-1, keepdims=True)
        heads.append(jnp.dot(p, vh, preferred_element_type=jnp.float32))
    y = heads[0] if n_head == 1 else jnp.concatenate(heads, axis=-1)

    y = jnp.dot(y.astype(wo_ref.dtype), wo_ref[...],
                preferred_element_type=jnp.float32)
    y = y + bo_ref[...].astype(jnp.float32)
    o_ref[...] = (x + y).astype(o_ref.dtype)                 # residual fused


def attn_forward(x, g1, b1, w_qkv, b_qkv, w_o, b_o, *, n_head):
    B, T, E = x.shape
    kern = functools.partial(_attn_kernel, n_head=n_head)
    return pl.pallas_call(
        kern,
        out_shape=jax.ShapeDtypeStruct((B, T, E), x.dtype),
        grid_spec=pltpu.PrefetchScalarGridSpec(
            num_scalar_prefetch=0,
            grid=(B,),
            in_specs=[
                pl.BlockSpec((None, T, E), lambda b: (b, 0, 0)),   # x (squeezed)
                pl.BlockSpec((1, E), lambda b: (0, 0)),            # ln1 gamma
                pl.BlockSpec((1, E), lambda b: (0, 0)),            # ln1 beta
                pl.BlockSpec((E, 3 * E), lambda b: (0, 0)),        # W_qkv
                pl.BlockSpec((1, 3 * E), lambda b: (0, 0)),        # b_qkv
                pl.BlockSpec((E, E), lambda b: (0, 0)),            # W_proj
                pl.BlockSpec((1, E), lambda b: (0, 0)),            # b_proj
            ],
            out_specs=pl.BlockSpec((None, T, E), lambda b: (b, 0, 0)),
        ),
        compiler_params=pltpu.CompilerParams(
            dimension_semantics=("parallel",)),
    )(x, g1.reshape(1, E), b1.reshape(1, E), w_qkv, b_qkv.reshape(1, 3 * E),
      w_o, b_o.reshape(1, E))


# ---------------------------------------------------------------------------
# Fused ln_2 + MLP (c_fc -> tanh GELU -> c_proj) + residual.
# Grid = (rows/tm  [parallel],  H/th  [arbitrary, streamed with accumulator]).
# ---------------------------------------------------------------------------
def _mlp_kernel(x_ref, g2_ref, b2_ref, wfc_ref, bfc_ref, wpj_ref, bpj_ref,
                o_ref, xn_sc, acc_sc):
    h = pl.program_id(1)

    @pl.when(h == 0)
    def _init():
        x = x_ref[...].astype(jnp.float32)
        xn_sc[...] = _layernorm(x, g2_ref[...].astype(jnp.float32),
                                b2_ref[...].astype(jnp.float32))
        acc_sc[...] = jnp.zeros_like(acc_sc)

    xn = xn_sc[...]
    pre = jnp.dot(xn.astype(wfc_ref.dtype), wfc_ref[...],
                  preferred_element_type=jnp.float32)
    pre = pre + bfc_ref[...].astype(jnp.float32)
    g = _gelu_tanh(pre)                                       # f32 GELU
    acc_sc[...] += jnp.dot(g.astype(wpj_ref.dtype), wpj_ref[...],
                           preferred_element_type=jnp.float32)

    @pl.when(h == pl.num_programs(1) - 1)
    def _finalize():
        out = (acc_sc[...] + bpj_ref[...].astype(jnp.float32)
               + x_ref[...].astype(jnp.float32))              # residual fused
        o_ref[...] = out.astype(o_ref.dtype)


def mlp_forward(x2, g2, b2, w_fc, b_fc, w_proj, b_proj, *, tm=256, th=128):
    M, E = x2.shape
    H = w_fc.shape[1]

    tm = min(tm, _round_up(M, 8))
    Mp = _round_up(M, tm)
    if H % 128 != 0 or th > H or H % th != 0:
        th = H                                   # fall back: full hidden block
    n_h = H // th

    x2p = x2 if Mp == M else jnp.pad(x2, ((0, Mp - M), (0, 0)))

    itemsize = jnp.dtype(x2.dtype).itemsize
    cost = pl.CostEstimate(
        flops=4 * Mp * E * H + 10 * Mp * H,
        transcendentals=Mp * H,
        bytes_accessed=itemsize * (2 * M * E + 2 * E * H + H + 3 * E))

    vmem_est = 4 * (2 * 2 * tm * E                 # x + out tiles, 2x buffered
                    + 2 * (E * th + th + th * E)   # streamed W_fc/b_fc/W_proj
                    + 2 * 4 * E                    # ln2 gamma/beta + b_proj
                    + 2 * tm * E)                  # f32 scratch (xn + acc)
    vmem_limit = int(min(64 * 1024 * 1024, max(32 * 1024 * 1024, 2 * vmem_est)))

    out = pl.pallas_call(
        _mlp_kernel,
        out_shape=jax.ShapeDtypeStruct((Mp, E), x2.dtype),
        grid_spec=pltpu.PrefetchScalarGridSpec(
            num_scalar_prefetch=0,
            grid=(Mp // tm, n_h),
            in_specs=[
                pl.BlockSpec((tm, E), lambda i, h: (i, 0)),    # x rows
                pl.BlockSpec((1, E), lambda i, h: (0, 0)),     # ln2 gamma
                pl.BlockSpec((1, E), lambda i, h: (0, 0)),     # ln2 beta
                pl.BlockSpec((E, th), lambda i, h: (0, h)),    # W_fc slab
                pl.BlockSpec((1, th), lambda i, h: (0, h)),    # b_fc slab
                pl.BlockSpec((th, E), lambda i, h: (h, 0)),    # W_proj slab
                pl.BlockSpec((1, E), lambda i, h: (0, 0)),     # b_proj
            ],
            out_specs=pl.BlockSpec((tm, E), lambda i, h: (i, 0)),
            scratch_shapes=[pltpu.VMEM((tm, E), jnp.float32),   # xn
                            pltpu.VMEM((tm, E), jnp.float32)],  # acc
        ),
        compiler_params=pltpu.CompilerParams(
            dimension_semantics=("parallel", "arbitrary"),
            vmem_limit_bytes=vmem_limit),
        cost_estimate=cost,
    )(x2p, g2.reshape(1, E), b2.reshape(1, E), w_fc, b_fc.reshape(1, H),
      w_proj, b_proj.reshape(1, E))

    return out if Mp == M else out[:M]


# ---------------------------------------------------------------------------
# Fused ln_f + lm_head (weight tied to wte, no bias).
# ---------------------------------------------------------------------------
def _lm_head_kernel(x_ref, gf_ref, bf_ref, wte_t_ref, o_ref):
    x = x_ref[...].astype(jnp.float32)
    xn = _layernorm(x, gf_ref[...].astype(jnp.float32),
                    bf_ref[...].astype(jnp.float32))
    o_ref[...] = jnp.dot(xn.astype(wte_t_ref.dtype), wte_t_ref[...],
                         preferred_element_type=jnp.float32).astype(o_ref.dtype)


def lm_head_forward(x2, gf, bf, wte, *, tm=256):
    # TODO(synk): for real vocab sizes (e.g. 50257) the vocab axis should be
    # tiled like the MLP hidden axis; at vocab=4 the full (E, V) tile is tiny.
    M, E = x2.shape
    V = wte.shape[0]
    tm = min(tm, _round_up(M, 8))
    Mp = _round_up(M, tm)
    x2p = x2 if Mp == M else jnp.pad(x2, ((0, Mp - M), (0, 0)))
    out = pl.pallas_call(
        _lm_head_kernel,
        out_shape=jax.ShapeDtypeStruct((Mp, V), x2.dtype),
        grid_spec=pltpu.PrefetchScalarGridSpec(
            num_scalar_prefetch=0,
            grid=(Mp // tm,),
            in_specs=[
                pl.BlockSpec((tm, E), lambda i: (i, 0)),
                pl.BlockSpec((1, E), lambda i: (0, 0)),
                pl.BlockSpec((1, E), lambda i: (0, 0)),
                pl.BlockSpec((E, V), lambda i: (0, 0)),
            ],
            out_specs=pl.BlockSpec((tm, V), lambda i: (i, 0)),
        ),
        compiler_params=pltpu.CompilerParams(
            dimension_semantics=("parallel",)),
    )(x2p, gf.reshape(1, E), bf.reshape(1, E), wte.T)
    return out if Mp == M else out[:M]


# ---------------------------------------------------------------------------
# Full GPT forward (targets=None -> logits only, loss is None).
# ---------------------------------------------------------------------------
@functools.partial(jax.jit, static_argnames=("n_head", "tm", "th"))
def gpt_forward(idx, params, *, n_head, tm=256, th=128):
    wte, wpe = params["wte"], params["wpe"]
    B, T = idx.shape
    E = wte.shape[1]
    # TODO(synk): data-dependent embedding gather stays in JAX (no rectangular
    # BlockSpec equivalent); everything downstream runs in Pallas kernels.
    x = wte[idx] + wpe[jnp.arange(T)][None, :, :]

    for blk in params["blocks"]:
        x = attn_forward(x, blk["ln1_g"], blk["ln1_b"], blk["w_qkv"],
                         blk["b_qkv"], blk["w_attn_proj"], blk["b_attn_proj"],
                         n_head=n_head)
        x2 = mlp_forward(x.reshape(B * T, E), blk["ln2_g"], blk["ln2_b"],
                         blk["w_fc"], blk["b_fc"], blk["w_mlp_proj"],
                         blk["b_mlp_proj"], tm=tm, th=th)
        x = x2.reshape(B, T, E)

    logits2 = lm_head_forward(x.reshape(B * T, E), params["lnf_g"],
                              params["lnf_b"], wte, tm=tm)
    return logits2.reshape(B, T, -1)


# ---------------------------------------------------------------------------
# Pure-JAX reference (mirrors the PyTorch module).
# ---------------------------------------------------------------------------
def _ln_ref(x, g, b):
    mu = x.mean(-1, keepdims=True)
    var = ((x - mu) ** 2).mean(-1, keepdims=True)
    return (x - mu) / jnp.sqrt(var + _LN_EPS) * g + b


def gpt_reference(idx, params, *, n_head):
    wte, wpe = params["wte"], params["wpe"]
    B, T = idx.shape
    E = wte.shape[1]
    x = wte[idx] + wpe[jnp.arange(T)][None, :, :]
    for blk in params["blocks"]:
        xn = _ln_ref(x, blk["ln1_g"], blk["ln1_b"])
        qkv = xn @ blk["w_qkv"] + blk["b_qkv"]
        q, k, v = jnp.split(qkv, 3, axis=-1)
        hd = E // n_head
        q = q.reshape(B, T, n_head, hd).transpose(0, 2, 1, 3)
        k = k.reshape(B, T, n_head, hd).transpose(0, 2, 1, 3)
        v = v.reshape(B, T, n_head, hd).transpose(0, 2, 1, 3)
        s = (q @ k.transpose(0, 1, 3, 2)) / (E ** 0.5)
        mask = jnp.tril(jnp.ones((T, T), dtype=bool))
        s = jnp.where(mask[None, None], s, -jnp.inf)
        p = jax.nn.softmax(s, axis=-1)
        y = (p @ v).transpose(0, 2, 1, 3).reshape(B, T, E)
        x = x + y @ blk["w_attn_proj"] + blk["b_attn_proj"]
        xn2 = _ln_ref(x, blk["ln2_g"], blk["ln2_b"])
        hdn = _gelu_tanh(xn2 @ blk["w_fc"] + blk["b_fc"])
        x = x + hdn @ blk["w_mlp_proj"] + blk["b_mlp_proj"]
    xf = _ln_ref(x, params["lnf_g"], params["lnf_b"])
    return xf @ wte.T


if __name__ == "__main__":
    # GPTConfig defaults: block_size=12, vocab_size=4, n_layer=1, n_head=1, n_embd=64
    block_size, vocab, n_layer, n_head, E = 12, 4, 1, 1, 64
    B, T = 2, 8

    key = jax.random.PRNGKey(0)
    kit = iter(jax.random.split(key, 40))

    def nrm(shape, std=0.02):
        return jax.random.normal(next(kit), shape, dtype=jnp.float32) * std

    params = {
        "wte": nrm((vocab, E)),
        "wpe": nrm((block_size, E)),
        "lnf_g": jnp.ones((E,), jnp.float32),
        "lnf_b": jnp.zeros((E,), jnp.float32),
        "blocks": [],
    }
    for _ in range(n_layer):
        params["blocks"].append({
            "ln1_g": jnp.ones((E,), jnp.float32),
            "ln1_b": jnp.zeros((E,), jnp.float32),
            "w_qkv": nrm((E, 3 * E)),
            "b_qkv": nrm((3 * E,)),
            "w_attn_proj": nrm((E, E)),
            "b_attn_proj": nrm((E,)),
            "ln2_g": jnp.ones((E,), jnp.float32),
            "ln2_b": jnp.zeros((E,), jnp.float32),
            "w_fc": nrm((E, 4 * E)),
            "b_fc": nrm((4 * E,)),
            "w_mlp_proj": nrm((4 * E, E)),
            "b_mlp_proj": nrm((E,)),
        })

    idx = jax.random.randint(next(kit), (B, T), 0, vocab)

    logits = gpt_forward(idx, params, n_head=n_head, tm=256, th=128)
    logits = jax.block_until_ready(logits)

    ref = gpt_reference(idx, params, n_head=n_head)
    assert logits.shape == (B, T, vocab)
    assert jnp.allclose(logits, ref, atol=1e-4, rtol=1e-4), "mismatch vs reference"

    print("KERNEL_OK")
</pallas_src>

<mosaic_0001>
module attributes {stable_mosaic.version = 11 : i64} {
  func.func @_attn_kernel(%arg0: i32, %arg1: memref<1x8x64xf32, #tpu.memory_space<vmem>>, %arg2: memref<1x64xf32, #tpu.memory_space<vmem>>, %arg3: memref<1x64xf32, #tpu.memory_space<vmem>>, %arg4: memref<64x192xf32, #tpu.memory_space<vmem>>, %arg5: memref<1x192xf32, #tpu.memory_space<vmem>>, %arg6: memref<64x64xf32, #tpu.memory_space<vmem>>, %arg7: memref<1x64xf32, #tpu.memory_space<vmem>>, %arg8: memref<1x8x64xf32, #tpu.memory_space<vmem>>) attributes {dimension_semantics = [#tpu.dimension_semantics<parallel>], iteration_bounds = array<i64: 2>, scalar_prefetch = 0 : i64, scratch_operands = 0 : i64, tpu.core_type = #tpu.core_type<tc>, window_params = [{transform_indices = @transform_0, window_bounds = array<i64: 1, 8, 64>}, {pipeline_mode = #tpu.pipeline_mode<synchronous>, transform_indices = @transform_1, window_bounds = array<i64: 1, 64>}, {pipeline_mode = #tpu.pipeline_mode<synchronous>, transform_indices = @transform_2, window_bounds = array<i64: 1, 64>}, {pipeline_mode = #tpu.pipeline_mode<synchronous>, transform_indices = @transform_3, window_bounds = array<i64: 64, 192>}, {pipeline_mode = #tpu.pipeline_mode<synchronous>, transform_indices = @transform_4, window_bounds = array<i64: 1, 192>}, {pipeline_mode = #tpu.pipeline_mode<synchronous>, transform_indices = @transform_5, window_bounds = array<i64: 64, 64>}, {pipeline_mode = #tpu.pipeline_mode<synchronous>, transform_indices = @transform_6, window_bounds = array<i64: 1, 64>}, {transform_indices = @transform_7, window_bounds = array<i64: 1, 8, 64>}]} {
    %c0 = arith.constant 0 : index
    %c0_0 = arith.constant 0 : index
    %c0_1 = arith.constant 0 : index
    %0 = vector.load %arg1[%c0, %c0_0, %c0_1] : memref<1x8x64xf32, #tpu.memory_space<vmem>>, vector<1x8x64xf32>
    %1 = vector.shape_cast %0 : vector<1x8x64xf32> to vector<8x64xf32>
    %c0_2 = arith.constant 0 : index
    %c0_3 = arith.constant 0 : index
    %2 = vector.load %arg2[%c0_2, %c0_3] : memref<1x64xf32, #tpu.memory_space<vmem>>, vector<1x64xf32>
    %c0_4 = arith.constant 0 : index
    %c0_5 = arith.constant 0 : index
    %3 = vector.load %arg3[%c0_4, %c0_5] : memref<1x64xf32, #tpu.memory_space<vmem>>, vector<1x64xf32>
    %cst = arith.constant dense<0.000000e+00> : vector<8xf32>
    %4 = vector.multi_reduction <add>, %1, %cst [1] : vector<8x64xf32> to vector<8xf32>
    %5 = vector.shape_cast %4 : vector<8xf32> to vector<8x1xf32>
    %cst_6 = arith.constant 6.400000e+01 : f32
    %6 = vector.broadcast %cst_6 : f32 to vector<8x1xf32>
    %7 = arith.divf %5, %6 : vector<8x1xf32>
    %8 = vector.broadcast %7 : vector<8x1xf32> to vector<8x64xf32>
    %9 = arith.subf %1, %8 : vector<8x64xf32>
    %10 = arith.mulf %9, %9 : vector<8x64xf32>
    %cst_7 = arith.constant dense<0.000000e+00> : vector<8xf32>
    %11 = vector.multi_reduction <add>, %10, %cst_7 [1] : vector<8x64xf32> to vector<8xf32>
    %12 = vector.shape_cast %11 : vector<8xf32> to vector<8x1xf32>
    %cst_8 = arith.constant 6.400000e+01 : f32
    %13 = vector.broadcast %cst_8 : f32 to vector<8x1xf32>
    %14 = arith.divf %12, %13 : vector<8x1xf32>
    %cst_9 = arith.constant 9.99999974E-6 : f32
    %15 = vector.broadcast %cst_9 : f32 to vector<8x1xf32>
    %16 = arith.addf %14, %15 : vector<8x1xf32>
    %17 = math.rsqrt %16 : vector<8x1xf32>
    %18 = vector.broadcast %17 : vector<8x1xf32> to vector<8x64xf32>
    %19 = arith.mulf %9, %18 : vector<8x64xf32>
    %20 = vector.broadcast %2 : vector<1x64xf32> to vector<8x64xf32>
    %21 = arith.mulf %19, %20 : vector<8x64xf32>
    %22 = vector.broadcast %3 : vector<1x64xf32> to vector<8x64xf32>
    %23 = arith.addf %21, %22 : vector<8x64xf32>
    %c0_10 = arith.constant 0 : index
    %c0_11 = arith.constant 0 : index
    %24 = vector.load %arg4[%c0_10, %c0_11] : memref<64x192xf32, #tpu.memory_space<vmem>>, vector<64x192xf32>
    %cst_12 = arith.constant dense<0.000000e+00> : vector<8x192xf32>
    %25 = tpu.matmul %23, %24, %cst_12 {dimension_numbers = #tpu.dot_dimension_numbers<[1], [0], [0], [1], [0, 0, 1, 1], [], []>} : vector<8x64xf32>, vector<64x192xf32>, vector<8x192xf32> -> vector<8x192xf32>
    %c0_13 = arith.constant 0 : index
    %c0_14 = arith.constant 0 : index
    %26 = vector.load %arg5[%c0_13, %c0_14] : memref<1x192xf32, #tpu.memory_space<vmem>>, vector<1x192xf32>
    %27 = vector.broadcast %26 : vector<1x192xf32> to vector<8x192xf32>
    %28 = arith.addf %25, %27 : vector<8x192xf32>
    %29 = vector.extract_strided_slice %28 {offsets = [0, 0], sizes = [8, 64], strides = [1, 1]} : vector<8x192xf32> to vector<8x64xf32>
    %30 = vector.extract_strided_slice %28 {offsets = [0, 64], sizes = [8, 64], strides = [1, 1]} : vector<8x192xf32> to vector<8x64xf32>
    %31 = vector.extract_strided_slice %28 {offsets = [0, 128], sizes = [8, 64], strides = [1, 1]} : vector<8x192xf32> to vector<8x64xf32>
    %32 = tpu.iota {dimensions = array<i32: 0>} : vector<8x8xi32>
    %33 = tpu.iota {dimensions = array<i32: 1>} : vector<8x8xi32>
    %34 = arith.cmpi sle, %33, %32 : vector<8x8xi32>
    %35 = tpu.transpose %30, [1, 0] : vector<8x64xf32> -> vector<64x8xf32>
    %cst_15 = arith.constant dense<0.000000e+00> : vector<8x8xf32>
    %36 = tpu.matmul %29, %35, %cst_15 {dimension_numbers = #tpu.dot_dimension_numbers<[1], [0], [0], [1], [0, 0, 1, 1], [], []>} : vector<8x64xf32>, vector<64x8xf32>, vector<8x8xf32> -> vector<8x8xf32>
    %cst_16 = arith.constant 1.250000e-01 : f32
    %37 = vector.broadcast %cst_16 : f32 to vector<8x8xf32>
    %38 = arith.mulf %36, %37 : vector<8x8xf32>
    %cst_17 = arith.constant -1.000000e+30 : f32
    %39 = vector.broadcast %cst_17 : f32 to vector<8x8xf32>
    %40 = arith.select %34, %38, %39 : vector<8x8xi1>, vector<8x8xf32>
    %cst_18 = arith.constant dense<0xFF800000> : vector<8xf32>
    %41 = vector.multi_reduction <maximumf>, %40, %cst_18 [1] : vector<8x8xf32> to vector<8xf32>
    %42 = vector.shape_cast %41 : vector<8xf32> to vector<8x1xf32>
    %43 = vector.broadcast %42 : vector<8x1xf32> to vector<8x8xf32>
    %44 = arith.subf %40, %43 : vector<8x8xf32>
    %45 = math.exp %44 : vector<8x8xf32>
    %cst_19 = arith.constant dense<0.000000e+00> : vector<8xf32>
    %46 = vector.multi_reduction <add>, %45, %cst_19 [1] : vector<8x8xf32> to vector<8xf32>
    %47 = vector.shape_cast %46 : vector<8xf32> to vector<8x1xf32>
    %48 = vector.broadcast %47 : vector<8x1xf32> to vector<8x8xf32>
    %49 = arith.divf %45, %48 : vector<8x8xf32>
    %cst_20 = arith.constant dense<0.000000e+00> : vector<8x64xf32>
    %50 = tpu.matmul %49, %31, %cst_20 {dimension_numbers = #tpu.dot_dimension_numbers<[1], [0], [0], [1], [0, 0, 1, 1], [], []>} : vector<8x8xf32>, vector<8x64xf32>, vector<8x64xf32> -> vector<8x64xf32>
    %c0_21 = arith.constant 0 : index
    %c0_22 = arith.constant 0 : index
    %51 = vector.load %arg6[%c0_21, %c0_22] : memref<64x64xf32, #tpu.memory_space<vmem>>, vector<64x64xf32>
    %cst_23 = arith.constant dense<0.000000e+00> : vector<8x64xf32>
    %52 = tpu.matmul %50, %51, %cst_23 {dimension_numbers = #tpu.dot_dimension_numbers<[1], [0], [0], [1], [0, 0, 1, 1], [], []>} : vector<8x64xf32>, vector<64x64xf32>, vector<8x64xf32> -> vector<8x64xf32>
    %c0_24 = arith.constant 0 : index
    %c0_25 = arith.constant 0 : index
    %53 = vector.load %arg7[%c0_24, %c0_25] : memref<1x64xf32, #tpu.memory_space<vmem>>, vector<1x64xf32>
    %54 = vector.broadcast %53 : vector<1x64xf32> to vector<8x64xf32>
    %55 = arith.addf %52, %54 : vector<8x64xf32>
    %56 = arith.addf %1, %55 : vector<8x64xf32>
    %c0_26 = arith.constant 0 : index
    %c0_27 = arith.constant 0 : index
    %c0_28 = arith.constant 0 : index
    %57 = vector.load %arg8[%c0_26, %c0_27, %c0_28] : memref<1x8x64xf32, #tpu.memory_space<vmem>>, vector<1x8x64xf32>
    %58 = vector.shape_cast %57 : vector<1x8x64xf32> to vector<8x64xf32>
    %59 = vector.shape_cast %56 : vector<8x64xf32> to vector<1x8x64xf32>
    tpu.vector_store %arg8[%c0_26, %c0_27, %c0_28], %59 {strides = array<i32>} : memref<1x8x64xf32, #tpu.memory_space<vmem>>, vector<1x8x64xf32>,
    return
  }
  func.func @transform_0(%arg0: i32) -> (i32, i32, i32) {
    %c0_i32 = arith.constant 0 : i32
    %c0_i32_0 = arith.constant 0 : i32
    %c0_i32_1 = arith.constant 0 : i32
    return %arg0, %c0_i32, %c0_i32_0 : i32, i32, i32
  }
  func.func @transform_1(%arg0: i32) -> (i32, i32) {
    %c0_i32 = arith.constant 0 : i32
    %c0_i32_0 = arith.constant 0 : i32
    %c0_i32_1 = arith.constant 0 : i32
    return %c0_i32, %c0_i32_0 : i32, i32
  }
  func.func @transform_2(%arg0: i32) -> (i32, i32) {
    %c0_i32 = arith.constant 0 : i32
    %c0_i32_0 = arith.constant 0 : i32
    %c0_i32_1 = arith.constant 0 : i32
    return %c0_i32, %c0_i32_0 : i32, i32
  }
  func.func @transform_3(%arg0: i32) -> (i32, i32) {
    %c0_i32 = arith.constant 0 : i32
    %c0_i32_0 = arith.constant 0 : i32
    %c0_i32_1 = arith.constant 0 : i32
    return %c0_i32, %c0_i32_0 : i32, i32
  }
  func.func @transform_4(%arg0: i32) -> (i32, i32) {
    %c0_i32 = arith.constant 0 : i32
    %c0_i32_0 = arith.constant 0 : i32
    %c0_i32_1 = arith.constant 0 : i32
    return %c0_i32, %c0_i32_0 : i32, i32
  }
  func.func @transform_5(%arg0: i32) -> (i32, i32) {
    %c0_i32 = arith.constant 0 : i32
    %c0_i32_0 = arith.constant 0 : i32
    %c0_i32_1 = arith.constant 0 : i32
    return %c0_i32, %c0_i32_0 : i32, i32
  }
  func.func @transform_6(%arg0: i32) -> (i32, i32) {
    %c0_i32 = arith.constant 0 : i32
    %c0_i32_0 = arith.constant 0 : i32
    %c0_i32_1 = arith.constant 0 : i32
    return %c0_i32, %c0_i32_0 : i32, i32
  }
  func.func @transform_7(%arg0: i32) -> (i32, i32, i32) {
    %c0_i32 = arith.constant 0 : i32
    %c0_i32_0 = arith.constant 0 : i32
    %c0_i32_1 = arith.constant 0 : i32
    return %arg0, %c0_i32, %c0_i32_0 : i32, i32, i32
  }
}

module attributes {stable_mosaic.version = 11 : i64} {
  func.func @_mlp_kernel(%arg0: i32, %arg1: i32, %arg2: memref<16x64xf32, #tpu.memory_space<vmem>>, %arg3: memref<1x64xf32, #tpu.memory_space<vmem>>, %arg4: memref<1x64xf32, #tpu.memory_space<vmem>>, %arg5: memref<64x128xf32, #tpu.memory_space<vmem>>, %arg6: memref<1x128xf32, #tpu.memory_space<vmem>>, %arg7: memref<128x64xf32, #tpu.memory_space<vmem>>, %arg8: memref<1x64xf32, #tpu.memory_space<vmem>>, %arg9: memref<16x64xf32, #tpu.memory_space<vmem>>, %arg10: memref<16x64xf32, #tpu.memory_space<vmem>>, %arg11: memref<16x64xf32, #tpu.memory_space<vmem>>) attributes {dimension_semantics = [#tpu.dimension_semantics<parallel>, #tpu.dimension_semantics<arbitrary>], iteration_bounds = array<i64: 1, 2>, scalar_prefetch = 0 : i64, scratch_operands = 2 : i64, tpu.core_type = #tpu.core_type<tc>, window_params = [{transform_indices = @transform_0, window_bounds = array<i64: 16, 64>}, {pipeline_mode = #tpu.pipeline_mode<synchronous>, transform_indices = @transform_1, window_bounds = array<i64: 1, 64>}, {pipeline_mode = #tpu.pipeline_mode<synchronous>, transform_indices = @transform_2, window_bounds = array<i64: 1, 64>}, {transform_indices = @transform_3, window_bounds = array<i64: 64, 128>}, {transform_indices = @transform_4, window_bounds = array<i64: 1, 128>}, {transform_indices = @transform_5, window_bounds = array<i64: 128, 64>}, {pipeline_mode = #tpu.pipeline_mode<synchronous>, transform_indices = @transform_6, window_bounds = array<i64: 1, 64>}, {transform_indices = @transform_7, window_bounds = array<i64: 16, 64>}]} {
    %c0_i32 = arith.constant 0 : i32
    %0 = arith.cmpi eq, %arg1, %c0_i32 : i32
    %1 = arith.extui %0 : i1 to i32
    %c0_i32_0 = arith.constant 0 : i32
    %2 = arith.cmpi ne, %1, %c0_i32_0 : i32
    scf.if %2 {
      %c0_18 = arith.constant 0 : index
      %c0_19 = arith.constant 0 : index
      %30 = vector.load %arg2[%c0_18, %c0_19] : memref<16x64xf32, #tpu.memory_space<vmem>>, vector<16x64xf32>
      %c0_20 = arith.constant 0 : index
      %c0_21 = arith.constant 0 : index
      %31 = vector.load %arg3[%c0_20, %c0_21] : memref<1x64xf32, #tpu.memory_space<vmem>>, vector<1x64xf32>
      %c0_22 = arith.constant 0 : index
      %c0_23 = arith.constant 0 : index
      %32 = vector.load %arg4[%c0_22, %c0_23] : memref<1x64xf32, #tpu.memory_space<vmem>>, vector<1x64xf32>
      %cst_24 = arith.constant dense<0.000000e+00> : vector<16xf32>
      %33 = vector.multi_reduction <add>, %30, %cst_24 [1] : vector<16x64xf32> to vector<16xf32>
      %34 = vector.shape_cast %33 : vector<16xf32> to vector<16x1xf32>
      %cst_25 = arith.constant 6.400000e+01 : f32
      %35 = vector.broadcast %cst_25 : f32 to vector<16x1xf32>
      %36 = arith.divf %34, %35 : vector<16x1xf32>
      %37 = vector.broadcast %36 : vector<16x1xf32> to vector<16x64xf32>
      %38 = arith.subf %30, %37 : vector<16x64xf32>
      %39 = arith.mulf %38, %38 : vector<16x64xf32>
      %cst_26 = arith.constant dense<0.000000e+00> : vector<16xf32>
      %40 = vector.multi_reduction <add>, %39, %cst_26 [1] : vector<16x64xf32> to vector<16xf32>
      %41 = vector.shape_cast %40 : vector<16xf32> to vector<16x1xf32>
      %cst_27 = arith.constant 6.400000e+01 : f32
      %42 = vector.broadcast %cst_27 : f32 to vector<16x1xf32>
      %43 = arith.divf %41, %42 : vector<16x1xf32>
      %cst_28 = arith.constant 9.99999974E-6 : f32
      %44 = vector.broadcast %cst_28 : f32 to vector<16x1xf32>
      %45 = arith.addf %43, %44 : vector<16x1xf32>
      %46 = math.rsqrt %45 : vector<16x1xf32>
      %47 = vector.broadcast %46 : vector<16x1xf32> to vector<16x64xf32>
      %48 = arith.mulf %38, %47 : vector<16x64xf32>
      %49 = vector.broadcast %31 : vector<1x64xf32> to vector<16x64xf32>
      %50 = arith.mulf %48, %49 : vector<16x64xf32>
      %51 = vector.broadcast %32 : vector<1x64xf32> to vector<16x64xf32>
      %52 = arith.addf %50, %51 : vector<16x64xf32>
      %c0_29 = arith.constant 0 : index
      %c0_30 = arith.constant 0 : index
      %53 = vector.load %arg10[%c0_29, %c0_30] : memref<16x64xf32, #tpu.memory_space<vmem>>, vector<16x64xf32>
      tpu.vector_store %arg10[%c0_29, %c0_30], %52 {strides = array<i32>} : memref<16x64xf32, #tpu.memory_space<vmem>>, vector<16x64xf32>,
      %cst_31 = arith.constant 0.000000e+00 : f32
      %54 = vector.broadcast %cst_31 : f32 to vector<16x64xf32>
      %c0_32 = arith.constant 0 : index
      %c0_33 = arith.constant 0 : index
      %55 = vector.load %arg11[%c0_32, %c0_33] : memref<16x64xf32, #tpu.memory_space<vmem>>, vector<16x64xf32>
      tpu.vector_store %arg11[%c0_32, %c0_33], %54 {strides = array<i32>} : memref<16x64xf32, #tpu.memory_space<vmem>>, vector<16x64xf32>,
    } else {
    }
    %c0 = arith.constant 0 : index
    %c0_1 = arith.constant 0 : index
    %3 = vector.load %arg10[%c0, %c0_1] : memref<16x64xf32, #tpu.memory_space<vmem>>, vector<16x64xf32>
    %c0_2 = arith.constant 0 : index
    %c0_3 = arith.constant 0 : index
    %4 = vector.load %arg5[%c0_2, %c0_3] : memref<64x128xf32, #tpu.memory_space<vmem>>, vector<64x128xf32>
    %cst = arith.constant dense<0.000000e+00> : vector<16x128xf32>
    %5 = tpu.matmul %3, %4, %cst {dimension_numbers = #tpu.dot_dimension_numbers<[1], [0], [0], [1], [0, 0, 1, 1], [], []>} : vector<16x64xf32>, vector<64x128xf32>, vector<16x128xf32> -> vector<16x128xf32>
    %c0_4 = arith.constant 0 : index
    %c0_5 = arith.constant 0 : index
    %6 = vector.load %arg6[%c0_4, %c0_5] : memref<1x128xf32, #tpu.memory_space<vmem>>, vector<1x128xf32>
    %7 = vector.broadcast %6 : vector<1x128xf32> to vector<16x128xf32>
    %8 = arith.addf %5, %7 : vector<16x128xf32>
    %cst_6 = arith.constant 5.000000e-01 : f32
    %9 = vector.broadcast %cst_6 : f32 to vector<16x128xf32>
    %10 = arith.mulf %9, %8 : vector<16x128xf32>
    %cst_7 = arith.constant 4.471500e-02 : f32
    %11 = vector.broadcast %cst_7 : f32 to vector<16x128xf32>
    %12 = arith.mulf %11, %8 : vector<16x128xf32>
    %13 = arith.mulf %12, %8 : vector<16x128xf32>
    %14 = arith.mulf %13, %8 : vector<16x128xf32>
    %15 = arith.addf %8, %14 : vector<16x128xf32>
    %cst_8 = arith.constant 0.797884583 : f32
    %16 = vector.broadcast %cst_8 : f32 to vector<16x128xf32>
    %17 = arith.mulf %16, %15 : vector<16x128xf32>
    %18 = math.tanh %17 : vector<16x128xf32>
    %cst_9 = arith.constant 1.000000e+00 : f32
    %19 = vector.broadcast %cst_9 : f32 to vector<16x128xf32>
    %20 = arith.addf %19, %18 : vector<16x128xf32>
    %21 = arith.mulf %10, %20 : vector<16x128xf32>
    %c0_10 = arith.constant 0 : index
    %c0_11 = arith.constant 0 : index
    %22 = vector.load %arg11[%c0_10, %c0_11] : memref<16x64xf32, #tpu.memory_space<vmem>>, vector<16x64xf32>
    %c0_12 = arith.constant 0 : index
    %c0_13 = arith.constant 0 : index
    %23 = vector.load %arg7[%c0_12, %c0_13] : memref<128x64xf32, #tpu.memory_space<vmem>>, vector<128x64xf32>
    %cst_14 = arith.constant dense<0.000000e+00> : vector<16x64xf32>
    %24 = tpu.matmul %21, %23, %cst_14 {dimension_numbers = #tpu.dot_dimension_numbers<[1], [0], [0], [1], [0, 0, 1, 1], [], []>} : vector<16x128xf32>, vector<128x64xf32>, vector<16x64xf32> -> vector<16x64xf32>
    %25 = arith.addf %22, %24 : vector<16x64xf32>
    %c0_15 = arith.constant 0 : index
    %c0_16 = arith.constant 0 : index
    %26 = vector.load %arg11[%c0_15, %c0_16] : memref<16x64xf32, #tpu.memory_space<vmem>>, vector<16x64xf32>
    tpu.vector_store %arg11[%c0_15, %c0_16], %25 {strides = array<i32>} : memref<16x64xf32, #tpu.memory_space<vmem>>, vector<16x64xf32>,
    %c1_i32 = arith.constant 1 : i32
    %27 = arith.cmpi eq, %arg1, %c1_i32 : i32
    %28 = arith.extui %27 : i1 to i32
    %c0_i32_17 = arith.constant 0 : i32
    %29 = arith.cmpi ne, %28, %c0_i32_17 : i32
    scf.if %29 {
      %c0_18 = arith.constant 0 : index
      %c0_19 = arith.constant 0 : index
      %30 = vector.load %arg11[%c0_18, %c0_19] : memref<16x64xf32, #tpu.memory_space<vmem>>, vector<16x64xf32>
      %c0_20 = arith.constant 0 : index
      %c0_21 = arith.constant 0 : index
      %31 = vector.load %arg8[%c0_20, %c0_21] : memref<1x64xf32, #tpu.memory_space<vmem>>, vector<1x64xf32>
      %32 = vector.broadcast %31 : vector<1x64xf32> to vector<16x64xf32>
      %33 = arith.addf %30, %32 : vector<16x64xf32>
      %c0_22 = arith.constant 0 : index
      %c0_23 = arith.constant 0 : index
      %34 = vector.load %arg2[%c0_22, %c0_23] : memref<16x64xf32, #tpu.memory_space<vmem>>, vector<16x64xf32>
      %35 = arith.addf %33, %34 : vector<16x64xf32>
      %c0_24 = arith.constant 0 : index
      %c0_25 = arith.constant 0 : index
      %36 = vector.load %arg9[%c0_24, %c0_25] : memref<16x64xf32, #tpu.memory_space<vmem>>, vector<16x64xf32>
      tpu.vector_store %arg9[%c0_24, %c0_25], %35 {strides = array<i32>} : memref<16x64xf32, #tpu.memory_space<vmem>>, vector<16x64xf32>,
    } else {
    }
    return
  }
  func.func @transform_0(%arg0: i32, %arg1: i32) -> (i32, i32) {
    %c0_i32 = arith.constant 0 : i32
    %c0_i32_0 = arith.constant 0 : i32
    return %arg0, %c0_i32 : i32, i32
  }
  func.func @transform_1(%arg0: i32, %arg1: i32) -> (i32, i32) {
    %c0_i32 = arith.constant 0 : i32
    %c0_i32_0 = arith.constant 0 : i32
    %c0_i32_1 = arith.constant 0 : i32
    return %c0_i32, %c0_i32_0 : i32, i32
  }
  func.func @transform_2(%arg0: i32, %arg1: i32) -> (i32, i32) {
    %c0_i32 = arith.constant 0 : i32
    %c0_i32_0 = arith.constant 0 : i32
    %c0_i32_1 = arith.constant 0 : i32
    return %c0_i32, %c0_i32_0 : i32, i32
  }
  func.func @transform_3(%arg0: i32, %arg1: i32) -> (i32, i32) {
    %c0_i32 = arith.constant 0 : i32
    %c0_i32_0 = arith.constant 0 : i32
    return %c0_i32, %arg1 : i32, i32
  }
  func.func @transform_4(%arg0: i32, %arg1: i32) -> (i32, i32) {
    %c0_i32 = arith.constant 0 : i32
    %c0_i32_0 = arith.constant 0 : i32
    return %c0_i32, %arg1 : i32, i32
  }
  func.func @transform_5(%arg0: i32, %arg1: i32) -> (i32, i32) {
    %c0_i32 = arith.constant 0 : i32
    %c0_i32_0 = arith.constant 0 : i32
    return %arg1, %c0_i32 : i32, i32
  }
  func.func @transform_6(%arg0: i32, %arg1: i32) -> (i32, i32) {
    %c0_i32 = arith.constant 0 : i32
    %c0_i32_0 = arith.constant 0 : i32
    %c0_i32_1 = arith.constant 0 : i32
    return %c0_i32, %c0_i32_0 : i32, i32
  }
  func.func @transform_7(%arg0: i32, %arg1: i32) -> (i32, i32) {
    %c0_i32 = arith.constant 0 : i32
    %c0_i32_0 = arith.constant 0 : i32
    return %arg0, %c0_i32 : i32, i32
  }
}

module attributes {stable_mosaic.version = 11 : i64} {
  func.func @_lm_head_kernel(%arg0: i32, %arg1: memref<16x64xf32, #tpu.memory_space<vmem>>, %arg2: memref<1x64xf32, #tpu.memory_space<vmem>>, %arg3: memref<1x64xf32, #tpu.memory_space<vmem>>, %arg4: memref<64x4xf32, #tpu.memory_space<vmem>>, %arg5: memref<16x4xf32, #tpu.memory_space<vmem>>) attributes {dimension_semantics = [#tpu.dimension_semantics<parallel>], iteration_bounds = array<i64: 1>, scalar_prefetch = 0 : i64, scratch_operands = 0 : i64, tpu.core_type = #tpu.core_type<tc>, window_params = [{transform_indices = @transform_0, window_bounds = array<i64: 16, 64>}, {pipeline_mode = #tpu.pipeline_mode<synchronous>, transform_indices = @transform_1, window_bounds = array<i64: 1, 64>}, {pipeline_mode = #tpu.pipeline_mode<synchronous>, transform_indices = @transform_2, window_bounds = array<i64: 1, 64>}, {pipeline_mode = #tpu.pipeline_mode<synchronous>, transform_indices = @transform_3, window_bounds = array<i64: 64, 4>}, {transform_indices = @transform_4, window_bounds = array<i64: 16, 4>}]} {
    %c0 = arith.constant 0 : index
    %c0_0 = arith.constant 0 : index
    %0 = vector.load %arg1[%c0, %c0_0] : memref<16x64xf32, #tpu.memory_space<vmem>>, vector<16x64xf32>
    %c0_1 = arith.constant 0 : index
    %c0_2 = arith.constant 0 : index
    %1 = vector.load %arg2[%c0_1, %c0_2] : memref<1x64xf32, #tpu.memory_space<vmem>>, vector<1x64xf32>
    %c0_3 = arith.constant 0 : index
    %c0_4 = arith.constant 0 : index
    %2 = vector.load %arg3[%c0_3, %c0_4] : memref<1x64xf32, #tpu.memory_space<vmem>>, vector<1x64xf32>
    %cst = arith.constant dense<0.000000e+00> : vector<16xf32>
    %3 = vector.multi_reduction <add>, %0, %cst [1] : vector<16x64xf32> to vector<16xf32>
    %4 = vector.shape_cast %3 : vector<16xf32> to vector<16x1xf32>
    %cst_5 = arith.constant 6.400000e+01 : f32
    %5 = vector.broadcast %cst_5 : f32 to vector<16x1xf32>
    %6 = arith.divf %4, %5 : vector<16x1xf32>
    %7 = vector.broadcast %6 : vector<16x1xf32> to vector<16x64xf32>
    %8 = arith.subf %0, %7 : vector<16x64xf32>
    %9 = arith.mulf %8, %8 : vector<16x64xf32>
    %cst_6 = arith.constant dense<0.000000e+00> : vector<16xf32>
    %10 = vector.multi_reduction <add>, %9, %cst_6 [1] : vector<16x64xf32> to vector<16xf32>
    %11 = vector.shape_cast %10 : vector<16xf32> to vector<16x1xf32>
    %cst_7 = arith.constant 6.400000e+01 : f32
    %12 = vector.broadcast %cst_7 : f32 to vector<16x1xf32>
    %13 = arith.divf %11, %12 : vector<16x1xf32>
    %cst_8 = arith.constant 9.99999974E-6 : f32
    %14 = vector.broadcast %cst_8 : f32 to vector<16x1xf32>
    %15 = arith.addf %13, %14 : vector<16x1xf32>
    %16 = math.rsqrt %15 : vector<16x1xf32>
    %17 = vector.broadcast %16 : vector<16x1xf32> to vector<16x64xf32>
    %18 = arith.mulf %8, %17 : vector<16x64xf32>
    %19 = vector.broadcast %1 : vector<1x64xf32> to vector<16x64xf32>
    %20 = arith.mulf %18, %19 : vector<16x64xf32>
    %21 = vector.broadcast %2 : vector<1x64xf32> to vector<16x64xf32>
    %22 = arith.addf %20, %21 : vector<16x64xf32>
    %c0_9 = arith.constant 0 : index
    %c0_10 = arith.constant 0 : index
    %23 = vector.load %arg4[%c0_9, %c0_10] : memref<64x4xf32, #tpu.memory_space<vmem>>, vector<64x4xf32>
    %cst_11 = arith.constant dense<0.000000e+00> : vector<16x4xf32>
    %24 = tpu.matmul %22, %23, %cst_11 {dimension_numbers = #tpu.dot_dimension_numbers<[1], [0], [0], [1], [0, 0, 1, 1], [], []>} : vector<16x64xf32>, vector<64x4xf32>, vector<16x4xf32> -> vector<16x4xf32>
    %c0_12 = arith.constant 0 : index
    %c0_13 = arith.constant 0 : index
    %25 = vector.load %arg5[%c0_12, %c0_13] : memref<16x4xf32, #tpu.memory_space<vmem>>, vector<16x4xf32>
    tpu.vector_store %arg5[%c0_12, %c0_13], %24 {strides = array<i32>} : memref<16x4xf32, #tpu.memory_space<vmem>>, vector<16x4xf32>,
    return
  }
  func.func @transform_0(%arg0: i32) -> (i32, i32) {
    %c0_i32 = arith.constant 0 : i32
    %c0_i32_0 = arith.constant 0 : i32
    return %arg0, %c0_i32 : i32, i32
  }
  func.func @transform_1(%arg0: i32) -> (i32, i32) {
    %c0_i32 = arith.constant 0 : i32
    %c0_i32_0 = arith.constant 0 : i32
    %c0_i32_1 = arith.constant 0 : i32
    return %c0_i32, %c0_i32_0 : i32, i32
  }
  func.func @transform_2(%arg0: i32) -> (i32, i32) {
    %c0_i32 = arith.constant 0 : i32
    %c0_i32_0 = arith.constant 0 : i32
    %c0_i32_1 = arith.constant 0 : i32
    return %c0_i32, %c0_i32_0 : i32, i32
  }
  func.func @transform_3(%arg0: i32) -> (i32, i32) {
    %c0_i32 = arith.constant 0 : i32
    %c0_i32_0 = arith.constant 0 : i32
    %c0_i32_1 = arith.constant 0 : i32
    return %c0_i32, %c0_i32_0 : i32, i32
  }
  func.func @transform_4(%arg0: i32) -> (i32, i32) {
    %c0_i32 = arith.constant 0 : i32
    %c0_i32_0 = arith.constant 0 : i32
    return %arg0, %c0_i32 : i32, i32
  }
}

</mosaic_0001>

<bundles_post_ra>
// kernel: gpt_forward.5
= control target key start
LH: loop header
LB: loop body
LE: loop exit
PB: predicated region body
PF: predicated region fallthrough
CT: control target
= control target key end

     0   :  { %vm21_vm0 = vcmask 523264   ;;  %vm154_vm1 = vcmask 31744   ;;  %s287_s0 = inlined_call_operand.vmem [shape: f32[16,64], index: 0, kind: input, shape index: {}]   ;;  %s288_s3 = inlined_call_operand.vmem [shape: f32[64,4], index: 3, kind: input, shape index: {}]   ;;  %s289_s1 = inlined_call_operand.vmem [shape: f32[1,64], index: 1, kind: input, shape index: {}]   ;;  %s290_s2 = inlined_call_operand.vmem [shape: f32[1,64], index: 2, kind: input, shape index: {}]   ;;  %s291_s4 = inlined_call_operand.vmem [shape: f32[16,4], index: 4, kind: output, shape index: {}]  }
   0x1   :  { %v17_v0 = vld [vmem:[%s287_s0] sm:$0xff]  ;;  %v18_v1 = vld [vmem:[%s287_s0 + $0x8] sm:$0xff]  ;;  %v67_v17 = vld [vmem:[%s288_s3 + $0x10] sm:$0xff] }
   0x2   :  { %v22_v2 = vsel %vm21_vm0, %v17_v0, 0.0  ;;  %v25_v3 = vsel %vm21_vm0, %v18_v1, 0.0  ;;  %v65_v14 = vld [vmem:[%s288_s3] sm:$0xff]  ;;  %v66_v15 = vld [vmem:[%s288_s3 + $0x8] sm:$0xff]  ;;  %v68_v18 = vld [vmem:[%s288_s3 + $0x18] sm:$0xff] }
   0x3   :  { %23 = vadd.xlane.f32.xlu0 %v22_v2  ;;  %v194_v16 = vpack.c.bf16 %v66_v15, %v65_v14  ;;  %v69_v19 = vld [vmem:[%s288_s3 + $0x20] sm:$0xff]  ;;  %v198_v20 = vpack.c.bf16 %v68_v18, %v67_v17  ;;  %v70_v21 = vld [vmem:[%s288_s3 + $0x28] sm:$0xff]  ;;  %v71_v23 = vld [vmem:[%s288_s3 + $0x30] sm:$0xff] }
   0x4   :  { %v202_v22 = vpack.c.bf16 %v70_v21, %v69_v19  ;;  %v72_v24 = vld [vmem:[%s288_s3 + $0x38] sm:$0xff]  ;;  %v161_v33 = vld [vmem:[%s289_s1] ss:$0 sm:$0xff] }
   0x5   :  { %195 = vmatprep.subr.bf16.mxu0 %v194_v16  ;;  %v206_v25 = vpack.c.bf16 %v72_v24, %v71_v23  ;;  %v162_v35 = vld [vmem:[%s290_s2] ss:$0 sm:$0xff] }
   0x6   :  { %197 = vmatpush3.bf16.msra.mxu0 %v194_v16 }
   0x7   :  { %26 = vadd.xlane.f32.xlu0 %v25_v3  ;;  %199 = vmatprep.subr.bf16.mxu0 %v198_v20 }
   0xa   :  { %201 = vmatpush3.bf16.msra.mxu0 %v198_v20 }
   0xb   :  { %203 = vmatprep.subr.bf16.mxu0 %v202_v22 }
   0xe   :  { %205 = vmatpush3.bf16.msra.mxu0 %v202_v22 }
   0xf   :  { %207 = vmatprep.subr.bf16.mxu0 %v206_v25 }
  0x12   :  { %209 = vmatpush3.bf16.msra.mxu0 %v206_v25 }
  0x90   :  { %v24_v4 = vpop.xlane.xlu0 %23 }
  0x91   :  { %v29_v5 = vmul.f32 0.015625, %v24_v4 }
  0x93   :  { %v31_v6 = vsub.f32 %v17_v0, %v29_v5 }
  0x94   :  { %v27_v7 = vpop.xlane.xlu0 %26 }
  0x95   :  { %v30_v8 = vmul.f32 0.015625, %v27_v7  ;;  %v33_v9 = vmul.f32 %v31_v6, %v31_v6 }
  0x97   :  { %v32_v10 = vsub.f32 %v18_v1, %v30_v8  ;;  %v35_v11 = vsel %vm21_vm0, %v33_v9, 0.0 }
  0x98   :  { %36 = vadd.xlane.f32.xlu1 %v35_v11 }
  0x99   :  { %v34_v12 = vmul.f32 %v32_v10, %v32_v10 }
  0x9b   :  { %v38_v13 = vsel %vm21_vm0, %v34_v12, 0.0 }
  0x9c   :  { %39 = vadd.xlane.f32.xlu1 %v38_v13 }
 0x125   :  { %v37_v26 = vpop.xlane.xlu1 %36 }
 0x126   :  { %v41_v27 = vmul.f32 0.015625, %v37_v26 }
 0x128   :  { %v43_v28 = vadd.f32 1e-05, %v41_v27 }
 0x129   :  { %v40_v29 = vpop.xlane.xlu1 %39 }
 0x12a   :  { %210 = vrsqrt.f32 %v43_v28  ;;  %v42_v30 = vmul.f32 0.015625, %v40_v29 }
 0x12c   :  { %v44_v31 = vadd.f32 1e-05, %v42_v30 }
 0x12e   :  { %212 = vrsqrt.f32 %v44_v31 }
 0x134   :  { %v211_v32 = vpop.eup %210 }
 0x135   :  { %v47_v34 = vmul.f32 %v211_v32, %v31_v6 }
 0x137   :  { %v55_v36 = vmul.f32 %v161_v33, %v47_v34 }
 0x138   :  { %v213_v37 = vpop.eup %212 }
 0x139   :  { %v48_v38 = vmul.f32 %v213_v37, %v32_v10  ;;  %v63_v39 = vadd.f32 %v162_v35, %v55_v36 }
 0x13b   :  { %v56_v40 = vmul.f32 %v161_v33, %v48_v38  ;;  %191 = vmatprep.mubr.msk.f32.mxu0 %vm21_vm0, %v63_v39 }
 0x13d   :  { %v64_v41 = vadd.f32 %v162_v35, %v56_v40 }
 0x13f   :  { %192 = vmatmul.mubr.msk.f32.vlgmr.msra.gmra.mrb[0].mxu0 %vm21_vm0, %v64_v41 }
 0x212   :  { %v193_v42 = vpop.f32.mrb[0].mxu0 }
 0x213   :  { %156 = vst.msk [vmem:[%s291_s4 + $0x8] sm:$0xff] %vm154_vm1, %v193_v42  ;;  %v145_v43 = vpop.f32.mrb[1].mxu0 }
 0x214   :  { %155 = vst.msk [vmem:[%s291_s4] sm:$0xff] %vm154_vm1, %v145_v43 }

// kernel: gpt_forward.4
= control target key start
LH: loop header
LB: loop body
LE: loop exit
PB: predicated region body
PF: predicated region fallthrough
CT: control target
= control target key end

     0   :  { %s1089_s24 = smov 0   ;;  %s1091_s25 = smov 0   ;;  %s1238_s0 = inlined_call_operand.vmem [shape: f32[16,64], index: 0, kind: input, shape index: {}]   ;;  %s1239_s1 = inlined_call_operand.vmem [shape: f32[1,64], index: 1, kind: input, shape index: {}]   ;;  %s1240_s2 = inlined_call_operand.vmem [shape: f32[1,64], index: 2, kind: input, shape index: {}]   ;;  %s1241_s3 = inlined_call_operand.vmem [shape: f32[64,256], index: 3, kind: input, shape index: {}]   ;;  %s1242_s4 = inlined_call_operand.vmem [shape: f32[1,256], index: 4, kind: input, shape index: {}]   ;;  %s1243_s5 = inlined_call_operand.vmem [shape: f32[256,64], index: 5, kind: input, shape index: {}]   ;;  %s1244_s6 = inlined_call_operand.vmem [shape: f32[1,64], index: 6, kind: input, shape index: {}]   ;;  %s1245_s7 = inlined_call_operand.vmem [shape: f32[16,64], index: 7, kind: output, shape index: {}]  }
   0x1   :  { %s1093_s26 = smov 0   ;;  %s1095_s27 = smov 0  }
   0x2   :  { %s1097_s28 = smov 0  }
   0x3 LB: > { %s26_s29 = sadd.s32 1, %s1042_s27  ;;  %p111_p1 = scmp.ne.s32.totalorder %s1034_s25, %s1030_s24  ;;  %s1046_s28 = sphi %s1097_s28, %s17_s28   ;;  %s1042_s27 = sphi %s1095_s27, %s1249_s27   ;;  %s1038_s26 = sphi %s1093_s26, %s1248_s26   ;;  %s1034_s25 = sphi %s1091_s25, %s1247_s25   ;;  %s1030_s24 = sphi %s1089_s24, %s1246_s24  }
   0x4   : > { %p27_p0 = scmp.ge.s32.totalorder %s26_s29, 2  ;;  %p112_p2 = scmp.eq.s32.totalorder %s1046_s28, 0 }
   0x5   : > { %s104_s8 = sadd.s32 1, %s1034_s25  ;;  %p810_p5 = scmp.ge.s32.totalorder %s1046_s28, 2 }
   0x6   : > { %s1251_s29 = smov (%p27_p0, %s26_s29), 0  ;;  %p113_p3 = por %p112_p2, %p111_p1 }
   0x7   : > { %s101_s30 = ssub.s32 %s1042_s27, %s1251_s29  ;;  %254 = sbr.rel (%p810_p5) target bundleno = 22 (0x16), region = 32 }
   0x8   : > { %p102_p4 = scmp.eq.s32.totalorder %s101_s30, 0 }
   0xa   : > { %s1124_s9 = scalar_select %p102_p4, %s1034_s25, %s104_s8  }
   0xe   : > { %257 = sbr.rel (!%p113_p3) target bundleno = 22 (0x16), region = 36  ;;  %s259_s10 = sand.u32 (%p113_p3), 1, %s1034_s25  }
   0xf   : > { %s812_s11 = sshll.u32 (%p113_p3), %s1042_s27, 3  ;;  %s811_s12 = sshll.u32 (%p113_p3), %s259_s10, 6 }
  0x10   : > { %s263_s15 = scalar_lea.vmem (%p113_p3), %s1241_s3, %s812_s11  ;;  %s261_s16 = scalar_lea.vmem (%p113_p3), [#allocation4], %s811_s12 }
  0x11   : > { %v305_v0 = vld [vmem:[%s263_s15] sm:$0xff] (%p113_p3)  ;;  %v307_v1 = vld [vmem:[%s263_s15 + $0x10] sm:$0xff] (%p113_p3) }
  0x12   : > { %v309_v2 = vld [vmem:[%s263_s15 + $0x20] sm:$0xff] (%p113_p3)  ;;  %306 = vst [vmem:[%s261_s16] sm:$0xff] (%p113_p3), %v305_v0  ;;  %308 = vst [vmem:[%s261_s16 + $0x8] sm:$0xff] (%p113_p3), %v307_v1  ;;  %v311_v3 = vld [vmem:[%s263_s15 + $0x30] sm:$0xff] (%p113_p3) }
  0x13   : > { %310 = vst [vmem:[%s261_s16 + $0x10] sm:$0xff] (%p113_p3), %v309_v2  ;;  %v313_v4 = vld [vmem:[%s263_s15 + $0x40] sm:$0xff] (%p113_p3)  ;;  %v315_v5 = vld [vmem:[%s263_s15 + $0x50] sm:$0xff] (%p113_p3)  ;;  %312 = vst [vmem:[%s261_s16 + $0x18] sm:$0xff] (%p113_p3), %v311_v3 }
  0x14   : > { %314 = vst [vmem:[%s261_s16 + $0x20] sm:$0xff] (%p113_p3), %v313_v4  ;;  %316 = vst [vmem:[%s261_s16 + $0x28] sm:$0xff] (%p113_p3), %v315_v5  ;;  %v317_v6 = vld [vmem:[%s263_s15 + $0x60] sm:$0xff] (%p113_p3)  ;;  %v319_v7 = vld [vmem:[%s263_s15 + $0x70] sm:$0xff] (%p113_p3) }
  0x15   : > { %318 = vst [vmem:[%s261_s16 + $0x30] sm:$0xff] %v317_v6  ;;  %320 = vst [vmem:[%s261_s16 + $0x38] sm:$0xff] %v319_v7 }
  0x16 PF: > { %p813_p6 = scmp.ge.s32.totalorder %s1046_s28, 1  ;;  %p340_p7 = scmp.lt.s32.totalorder %s1046_s28, 3 }
  0x18   : > { %p341_p8 = pnand %p813_p6, %p340_p7 }
  0x19   : > { %s347_s17 = sand.u32 (!%p341_p8), 1, %s1030_s24   ;;  %p397_p9 = scmp.lt.s32.totalorder (!%p341_p8), %s1038_s26, 1 }
  0x1a   : > { %344 = sbr.rel (%p341_p8) target bundleno = 842 (0x34a), region = 82  ;;  %s814_s18 = sshll.u32 (!%p341_p8), %s347_s17, 6 }
  0x1b   : > { %s815_s19 = sshll.u32 (!%p341_p8), %s1038_s26, 4  ;;  %s1149_s12 = scalar_lea.vmem (!%p341_p8), [#allocation4], %s814_s18 }
  0x1c   : > { %p401_p10 = scmp.lt.s32.totalorder (!%p341_p8), %s815_s19, 31  ;;  %p817_p11 = scmp.ne.s32.totalorder (!%p341_p8), %s1038_s26, 0 }
  0x21   : > { %s1138_s20 = scalar_select %p397_p9, %s1038_s26, 1 }
  0x22   : > { %s1253_s19 = smov (!%p401_p10, %s815_s19), 31  ;;  %415 = sbr.rel (%p817_p11) target bundleno = 354 (0x162), region = 90 }
  0x23   : > { %s399_s23 = scalar_lea.vmem %s1242_s4, %s1138_s20  ;;  %s816_s30 = sshll.u32 %s1253_s19, 3  ;;  %v416_v8 = vld [vmem:[%s1238_s0] sm:$0xff] (!%p817_p11)  ;;  %vm420_vm0 = vcmask (!%p817_p11), 523264   ;;  %v417_v9 = vld [vmem:[%s1238_s0 + $0x8] sm:$0xff] (!%p817_p11)  ;;  %v1048_v11 = vmov (!%p817_p11), 0.0  }
  0x24   : > { %s1147_s11 = scalar_lea.vmem %s1243_s5, %s816_s30  ;;  %v421_v10 = vsel (!%p817_p11), %vm420_vm0, %v416_v8, 0.0  ;;  %466 = vst.msk [vmem:[#allocation3] sm:$0xff] (!%p817_p11), %vm420_vm0, %v1048_v11  ;;  %467 = vst.msk [vmem:[#allocation3 + $0x8] sm:$0xff] (!%p817_p11), %vm420_vm0, %v1048_v11  ;;  %v424_v12 = vsel (!%p817_p11), %vm420_vm0, %v417_v9, 0.0  ;;  %v818_v30 = vld [vmem:[%s1239_s1] ss:$0 sm:$0xff] (!%p817_p11) }
  0x25   : > { %422 = vadd.xlane.f32.xlu0 (!%p817_p11), %v421_v10  ;;  %v819_v32 = vld [vmem:[%s1240_s2] ss:$0 sm:$0xff] (!%p817_p11) }
  0x29   : > { %425 = vadd.xlane.f32.xlu0 %v424_v12 }
  0xb2   : > { %v423_v13 = vpop.xlane.xlu0 %422 }
  0xb3   : > { %v428_v14 = vmul.f32 0.015625, %v423_v13 }
  0xb5   : > { %v430_v15 = vsub.f32 %v416_v8, %v428_v14 }
  0xb6   : > { %v426_v16 = vpop.xlane.xlu0 %425 }
  0xb7   : > { %v429_v17 = vmul.f32 0.015625, %v426_v16  ;;  %v432_v18 = vmul.f32 %v430_v15, %v430_v15 }
  0xb9   : > { %v431_v19 = vsub.f32 %v417_v9, %v429_v17  ;;  %v434_v20 = vsel %vm420_vm0, %v432_v18, 0.0 }
  0xba   : > { %435 = vadd.xlane.f32.xlu1 %v434_v20 }
  0xbb   : > { %v433_v21 = vmul.f32 %v431_v19, %v431_v19 }
  0xbd   : > { %v437_v22 = vsel %vm420_vm0, %v433_v21, 0.0 }
  0xbe   : > { %438 = vadd.xlane.f32.xlu1 %v437_v22 }
 0x147   : > { %v436_v23 = vpop.xlane.xlu1 %435 }
 0x148   : > { %v440_v24 = vmul.f32 0.015625, %v436_v23 }
 0x14a   : > { %v442_v25 = vadd.f32 1e-05, %v440_v24 }
 0x14b   : > { %v439_v26 = vpop.xlane.xlu1 %438 }
 0x14c   : > { %1000 = vrsqrt.f32 %v442_v25  ;;  %v441_v27 = vmul.f32 0.015625, %v439_v26 }
 0x14e   : > { %v443_v28 = vadd.f32 1e-05, %v441_v27 }
 0x150   : > { %1002 = vrsqrt.f32 %v443_v28 }
 0x156   : > { %v1001_v29 = vpop.eup %1000 }
 0x157   : > { %v446_v31 = vmul.f32 %v1001_v29, %v430_v15 }
 0x159   : > { %v454_v33 = vmul.f32 %v818_v30, %v446_v31 }
 0x15a   : > { %v1003_v34 = vpop.eup %1002 }
 0x15b   : > { %v462_v35 = vadd.f32 %v819_v32, %v454_v33  ;;  %v447_v36 = vmul.f32 %v1003_v34, %v431_v19 }
 0x15d   : > { %464 = vst.msk [vmem:[#allocation2] sm:$0xff] %vm420_vm0, %v462_v35  ;;  %v455_v37 = vmul.f32 %v818_v30, %v447_v36 }
 0x15f   : > { %v463_v38 = vadd.f32 %v819_v32, %v455_v37 }
 0x161   : > { %465 = vst.msk [vmem:[#allocation2 + $0x8] sm:$0xff] %vm420_vm0, %v463_v38 }
 0x162 PF: > { %v470_v39 = vld [vmem:[%s1149_s12] sm:$0xff]  ;;  %v471_v40 = vld [vmem:[%s1149_s12 + $0x8] sm:$0xff]  ;;  %v472_v41 = vld [vmem:[%s1149_s12 + $0x10] sm:$0xff]  ;;  %vm485_vm1 = vcmask 523264   ;;  %p823_p12 = scmp.ne.s32.totalorder %s1038_s26, 1 }
 0x163   : > { %v911_v42 = vpack.c.bf16 %v471_v40, %v470_v39  ;;  %v473_v43 = vld [vmem:[%s1149_s12 + $0x18] sm:$0xff]  ;;  %v474_v45 = vld [vmem:[%s1149_s12 + $0x20] sm:$0xff]  ;;  %v475_v46 = vld [vmem:[%s1149_s12 + $0x28] sm:$0xff] }
 0x164   : > { %v915_v44 = vpack.c.bf16 %v473_v43, %v472_v41  ;;  %v468_v47 = vld [vmem:[#allocation2] sm:$0xff]  ;;  %v588_v49 = vld [vmem:[%s1147_s11 + $0x8] sm:$0xff]  ;;  %v919_v51 = vpack.c.bf16 %v475_v46, %v474_v45  ;;  %v476_v52 = vld [vmem:[%s1149_s12 + $0x30] sm:$0xff] }
 0x165   : > { %912 = vmatprep.subr.bf16.mxu0 %v911_v42  ;;  %873 = vmatprep.mubr.msk.f32.mxu0 %vm485_vm1, %v468_v47  ;;  %v587_v48 = vld [vmem:[%s1147_s11] sm:$0xff]  ;;  %v477_v53 = vld [vmem:[%s1149_s12 + $0x38] sm:$0xff]  ;;  %v589_v56 = vld [vmem:[%s1147_s11 + $0x10] sm:$0xff] }
 0x166   : > { %914 = vmatpush3.bf16.msra.mxu0 %v911_v42  ;;  %v927_v50 = vpack.c.bf16 %v588_v49, %v587_v48  ;;  %v923_v54 = vpack.c.bf16 %v477_v53, %v476_v52  ;;  %v590_v57 = vld [vmem:[%s1147_s11 + $0x18] sm:$0xff]  ;;  %v591_v59 = vld [vmem:[%s1147_s11 + $0x20] sm:$0xff]  ;;  %v592_v60 = vld [vmem:[%s1147_s11 + $0x28] sm:$0xff] }
 0x167   : > { %916 = vmatprep.subr.bf16.mxu0 %v915_v44  ;;  %v931_v58 = vpack.c.bf16 %v590_v57, %v589_v56  ;;  %v935_v61 = vpack.c.bf16 %v592_v60, %v591_v59  ;;  %v593_v62 = vld [vmem:[%s1147_s11 + $0x30] sm:$0xff]  ;;  %v594_v63 = vld [vmem:[%s1147_s11 + $0x38] sm:$0xff]  ;;  %v595_v0 = vld [vmem:[%s1147_s11 + $0x40] sm:$0xff] }
 0x168   : > { %928 = vmatprep.subr.bf16.mxu1 %v927_v50  ;;  %v469_v55 = vld [vmem:[#allocation2 + $0x8] sm:$0xff]  ;;  %v939_v1 = vpack.c.bf16 %v594_v63, %v593_v62  ;;  %v597_v4 = vld [vmem:[%s1147_s11 + $0x50] sm:$0xff]  ;;  %v598_v5 = vld [vmem:[%s1147_s11 + $0x58] sm:$0xff] }
 0x169   : > { %930 = vmatpush3.bf16.msra.mxu1 %v927_v50  ;;  %v596_v2 = vld [vmem:[%s1147_s11 + $0x48] sm:$0xff]  ;;  %v947_v6 = vpack.c.bf16 %v598_v5, %v597_v4  ;;  %v599_v7 = vld [vmem:[%s1147_s11 + $0x60] sm:$0xff]  ;;  %v601_v10 = vld [vmem:[%s1147_s11 + $0x70] sm:$0xff] }
 0x16a   : > { %918 = vmatpush3.bf16.msra.mxu0 %v915_v44  ;;  %932 = vmatprep.subr.bf16.mxu1 %v931_v58  ;;  %v943_v3 = vpack.c.bf16 %v596_v2, %v595_v0  ;;  %v600_v8 = vld [vmem:[%s1147_s11 + $0x68] sm:$0xff]  ;;  %v602_v11 = vld [vmem:[%s1147_s11 + $0x78] sm:$0xff]  ;;  %v820_v13 = vld [vmem:[%s399_s23] ss:$0 sm:$0xff] }
 0x16b   : > { %920 = vmatprep.subr.bf16.mxu0 %v919_v51  ;;  %v951_v9 = vpack.c.bf16 %v600_v8, %v599_v7  ;;  %v955_v12 = vpack.c.bf16 %v602_v11, %v601_v10  ;;  %v586_v36 = vld [vmem:[#allocation3 + $0x8] sm:$0xff]  ;;  %v585_v37 = vld [vmem:[#allocation3] sm:$0xff]  ;;  %v824_v43 = vld [vmem:[%s1244_s6] ss:$0 sm:$0xff] (!%p823_p12) }
 0x16c   : > { %v697_v44 = vld [vmem:[%s1238_s0] sm:$0xff] (!%p823_p12)  ;;  %v698_v47 = vld [vmem:[%s1238_s0 + $0x8] sm:$0xff] (!%p823_p12) }
 0x16d   : > { %934 = vmatpush3.bf16.msra.mxu1 %v931_v58 }
 0x16e   : > { %922 = vmatpush3.bf16.msra.mxu0 %v919_v51  ;;  %936 = vmatprep.subr.bf16.mxu1 %v935_v61 }
 0x16f   : > { %924 = vmatprep.subr.bf16.mxu0 %v923_v54 }
 0x171   : > { %938 = vmatpush3.bf16.msra.mxu1 %v935_v61 }
 0x172   : > { %926 = vmatpush3.bf16.msra.mxu0 %v923_v54  ;;  %940 = vmatprep.subr.bf16.mxu1 %v939_v1 }
 0x175   : > { %874 = vmatmul.mubr.msk.f32.vlgmr.msra.gmra.mrb[0].mxu0 %vm485_vm1, %v469_v55  ;;  %942 = vmatpush3.bf16.msra.mxu1 %v939_v1 }
 0x176   : > { %944 = vmatprep.subr.bf16.mxu1 %v943_v3 }
 0x179   : > { %946 = vmatpush3.bf16.msra.mxu1 %v943_v3 }
 0x17a   : > { %948 = vmatprep.subr.bf16.mxu1 %v947_v6 }
 0x17d   : > { %950 = vmatpush3.bf16.msra.mxu1 %v947_v6 }
 0x17e   : > { %952 = vmatprep.subr.bf16.mxu1 %v951_v9 }
 0x181   : > { %954 = vmatpush3.bf16.msra.mxu1 %v951_v9 }
 0x182   : > { %956 = vmatprep.subr.bf16.mxu1 %v955_v12 }
 0x185   : > { %958 = vmatpush3.bf16.msra.mxu1 %v955_v12 }
 0x248   : > { %v875_v14 = vpop.f32.mrb[0].mxu0 }
 0x249   : > { %v564_v15 = vadd.f32 %v875_v14, %v820_v13  ;;  %v558_v16 = vpop.f32.mrb[1].mxu0 }
 0x24a   : > { %v559_v17 = vadd.f32 %v820_v13, %v558_v16 }
 0x24b   : > { %v570_v18 = vmul.f32 0.044715, %v564_v15  ;;  %v568_v33 = vmul.f32 0.5, %v564_v15 }
 0x24c   : > { %v569_v19 = vmul.f32 0.044715, %v559_v17  ;;  %v567_v31 = vmul.f32 0.5, %v559_v17 }
 0x24d   : > { %v572_v20 = vmul.f32 %v570_v18, %v564_v15 }
 0x24e   : > { %v571_v21 = vmul.f32 %v569_v19, %v559_v17 }
 0x24f   : > { %v574_v22 = vmul.f32 %v572_v20, %v564_v15 }
 0x250   : > { %v573_v23 = vmul.f32 %v571_v21, %v559_v17 }
 0x251   : > { %v576_v24 = vadd.f32 %v574_v22, %v564_v15 }
 0x252   : > { %v575_v25 = vadd.f32 %v573_v23, %v559_v17 }
 0x253   : > { %v578_v26 = vmul.f32 0.7978846, %v576_v24 }
 0x254   : > { %v577_v27 = vmul.f32 0.7978846, %v575_v25 }
 0x255   : > { %1004 = vtanh.f32 %v578_v26 }
 0x256   : > { %1006 = vtanh.f32 %v577_v27 }
 0x25f   : > { %v1005_v28 = vpop.eup %1004 }
 0x260   : > { %v1007_v29 = vpop.eup %1006  ;;  %v582_v30 = vadd.f32 1.0, %v1005_v28 }
 0x261   : > { %v581_v32 = vadd.f32 1.0, %v1007_v29 }
 0x262   : > { %v584_v35 = vmul.f32 %v582_v30, %v568_v33 }
 0x263   : > { %v583_v34 = vmul.f32 %v581_v32, %v567_v31 }
 0x265   : > { %908 = vmatprep.mubr.f32.mxu1 %v583_v34 }
 0x266   : > { %909 = vmatmul.mubr.f32.vlgmr.msra.gmra.mrb[0].mxu1 %v584_v35 }
 0x337   : > { %685 = sbr.rel (%p823_p12) target bundleno = 842 (0x34a), region = 94 }
 0x339   : > { %v910_v38 = vpop.f32.mrb[0].mxu1 }
 0x33a   : > { %v679_v39 = vadd.f32 %v910_v38, %v586_v36  ;;  %v669_v40 = vpop.f32.mrb[1].mxu1 }
 0x33b   : > { %v678_v41 = vadd.f32 %v669_v40, %v585_v37 }
 0x33c   : > { %681 = vst.msk [vmem:[#allocation3 + $0x8] sm:$0xff] %vm485_vm1, %v679_v39 }
 0x33d   : > { %680 = vst.msk [vmem:[#allocation3] sm:$0xff] %vm485_vm1, %v678_v41 }
 0x343   : > { %v687_v46 = vld [vmem:[#allocation3 + $0x8] sm:$0xff] }
 0x344   : > { %v686_v42 = vld [vmem:[#allocation3] sm:$0xff]  ;;  %v696_v48 = vadd.f32 %v824_v43, %v687_v46 }
 0x345   : > { %v695_v45 = vadd.f32 %v824_v43, %v686_v42 }
 0x346   : > { %v700_v50 = vadd.f32 %v698_v47, %v696_v48 }
 0x347   : > { %v699_v49 = vadd.f32 %v697_v44, %v695_v45 }
 0x348   : > { %702 = vst.msk [vmem:[%s1245_s7 + $0x8] sm:$0xff] %vm485_vm1, %v700_v50 }
 0x349   : > { %701 = vst.msk [vmem:[%s1245_s7] sm:$0xff] %vm485_vm1, %v699_v49 }
 0x34a PF: > { %s17_s28 = sadd.s32 1, %s1046_s28   ;;  %s1246_s24 = smov %s1034_s25 }
 0x34b   : > { %p14_p13 = scmp.ge.s32.totalorder %s17_s28, 4   ;;  %s1247_s25 = smov %s1124_s9 }
 0x34c   : > { %s1248_s26 = smov %s1042_s27  ;;  %s1249_s27 = smov %s1251_s29 }
 0x34d   :  { %16 = sbr.rel (!%p14_p13) target bundleno = 3 (0x3), region = 138 }

// kernel: gpt_forward.3
= control target key start
LH: loop header
LB: loop body
LE: loop exit
PB: predicated region body
PF: predicated region fallthrough
CT: control target
= control target key end

     0   :  { %s877_s24 = smov 0   ;;  %s1009_s0 = inlined_call_operand.vmem [shape: f32[2,8,64], index: 0, kind: input, shape index: {}]   ;;  %s1010_s1 = inlined_call_operand.vmem [shape: f32[1,64], index: 1, kind: input, shape index: {}]   ;;  %s1011_s2 = inlined_call_operand.vmem [shape: f32[1,64], index: 2, kind: input, shape index: {}]   ;;  %s1012_s3 = inlined_call_operand.vmem [shape: f32[64,192], index: 3, kind: input, shape index: {}]   ;;  %s1013_s4 = inlined_call_operand.vmem [shape: f32[1,192], index: 4, kind: input, shape index: {}]   ;;  %s1014_s5 = inlined_call_operand.vmem [shape: f32[64,64], index: 5, kind: input, shape index: {}]   ;;  %s1015_s6 = inlined_call_operand.vmem [shape: f32[1,64], index: 6, kind: input, shape index: {}]   ;;  %s1016_s7 = inlined_call_operand.vmem [shape: f32[2,8,64], index: 7, kind: output, shape index: {}]  }
   0x1 LB: > { %s720_s25 = sadd.s32 4294967295, %s831_s24   ;;  %p724_p0 = scmp.ge.s32.totalorder %s831_s24, 1  ;;  %s831_s24 = sphi %s877_s24, %s17_s24  }
   0x2   : > { %p236_p1 = scmp.lt.s32.totalorder %s831_s24, 3 }
   0x4   : > { %p237_p2 = pnand %p724_p0, %p236_p1 }
   0x5   : > { %p266_p3 = scmp.lt.s32.totalorder (!%p237_p2), %s720_s25, 1  ;;  %vm277_vm0 = vcmask (!%p237_p2), 523264   ;;  %v307_v7 = vld [vmem:[%s1012_s3 + $0x8] sm:$0xff] (!%p237_p2)  ;;  %v309_v8 = vld [vmem:[%s1012_s3 + $0x18] sm:$0xff] (!%p237_p2)  ;;  %v306_v10 = vld [vmem:[%s1012_s3] sm:$0xff] (!%p237_p2)  ;;  %v833_v20 = vmov (!%p237_p2), 0.0   ;;  %v324_v41 = vlaneseq (!%p237_p2) }
   0x6   : > { %240 = sbr.rel (%p237_p2) target bundleno = 1620 (0x654), region = 48  ;;  %v779_v9 = vpack.c.bf16 (!%p237_p2), %v309_v8, %v307_v7  ;;  %v308_v11 = vld [vmem:[%s1012_s3 + $0x10] sm:$0xff] (!%p237_p2)  ;;  %v311_v13 = vld [vmem:[%s1012_s3 + $0x28] sm:$0xff] (!%p237_p2)  ;;  %v313_v14 = vld [vmem:[%s1012_s3 + $0x38] sm:$0xff] (!%p237_p2)  ;;  %401 = vmatprep.mubr.f32.mxu0 (!%p237_p2), %v833_v20  ;;  %755 = vmatprep.subr.mxu1 (!%p237_p2), %v833_v20  ;;  %vm834_vm1 = vmmov (!%p237_p2), 0   ;;  %s835_s28 = smov (!%p237_p2), 64  }
   0x7   : > { %v781_v12 = vpack.c.bf16 (!%p237_p2), %v308_v11, %v306_v10  ;;  %v310_v15 = vld [vmem:[%s1012_s3 + $0x20] sm:$0xff] (!%p237_p2)  ;;  %v783_v16 = vpack.c.bf16 (!%p237_p2), %v313_v14, %v311_v13  ;;  %v312_v17 = vld [vmem:[%s1012_s3 + $0x30] sm:$0xff] (!%p237_p2)  ;;  %v315_v18 = vld [vmem:[%s1012_s3 + $0x48] sm:$0xff] (!%p237_p2)  ;;  %v325_v42 = vshrl.u32 (!%p237_p2), %v324_v41, 7  ;;  %757 = vmatprep.mubr.msk.f32.mxu1 (!%p237_p2), %vm834_vm1, %v833_v20  ;;  %v411_v53 = vand.u32 (!%p237_p2), 127, %v324_v41 }
   0x8   : > { %780 = vmatprep.subr.bf16.mxu0 (!%p237_p2), %v779_v9  ;;  %v317_v19 = vld [vmem:[%s1012_s3 + $0x58] sm:$0xff] (!%p237_p2)  ;;  %v785_v21 = vpack.c.bf16 (!%p237_p2), %v312_v17, %v310_v15  ;;  %v314_v23 = vld [vmem:[%s1012_s3 + $0x40] sm:$0xff] (!%p237_p2)  ;;  %v316_v24 = vld [vmem:[%s1012_s3 + $0x50] sm:$0xff] (!%p237_p2)  ;;  %vm492_vm3 = vcmask (!%p237_p2), 64512  }
   0x9   : > { %782 = vmatpush1.bf16.msra.mxu0 (!%p237_p2), %v781_v12  ;;  %v787_v22 = vpack.c.bf16 (!%p237_p2), %v317_v19, %v315_v18  ;;  %v319_v25 = vld [vmem:[%s1012_s3 + $0x68] sm:$0xff] (!%p237_p2)  ;;  %v321_v26 = vld [vmem:[%s1012_s3 + $0x78] sm:$0xff] (!%p237_p2)  ;;  %v789_v27 = vpack.c.bf16 (!%p237_p2), %v316_v24, %v314_v23  ;;  %v318_v29 = vld [vmem:[%s1012_s3 + $0x60] sm:$0xff] (!%p237_p2)  ;;  %v326_v43 = vsub.s32 (!%p237_p2), 0, %v325_v42  ;;  %v330_v45 = vsub.s32 (!%p237_p2), 1, %v325_v42 }
   0xa   : > { %784 = vmatprep.subr.bf16.mxu0 (!%p237_p2), %v783_v16  ;;  %v791_v28 = vpack.c.bf16 (!%p237_p2), %v321_v26, %v319_v25  ;;  %v320_v30 = vld [vmem:[%s1012_s3 + $0x70] sm:$0xff] (!%p237_p2)  ;;  %v727_v36 = vld [vmem:[%s1010_s1] ss:$0 sm:$0xff] (!%p237_p2)  ;;  %vm412_vm2 = vcmp.le.s32.totalorder (!%p237_p2), %v411_v53, %v325_v42  ;;  %v580_v9 = vld [vmem:[%s1014_s5 + $0x18] sm:$0xff] (!%p237_p2) }
   0xb   : > { %v793_v31 = vpack.c.bf16 (!%p237_p2), %v320_v30, %v318_v29  ;;  %v728_v38 = vld [vmem:[%s1011_s2] ss:$0 sm:$0xff] (!%p237_p2)  ;;  %v579_v8 = vld [vmem:[%s1014_s5 + $0x10] sm:$0xff] (!%p237_p2)  ;;  %v582_v12 = vld [vmem:[%s1014_s5 + $0x28] sm:$0xff] (!%p237_p2) }
   0xc   : > { %v322_v44 = vld [vmem:[%s1013_s4] sm:$0x3] (!%p237_p2)  ;;  %v799_v10 = vpack.c.bf16 (!%p237_p2), %v580_v9, %v579_v8  ;;  %v583_v14 = vld [vmem:[%s1014_s5 + $0x30] sm:$0xff] (!%p237_p2)  ;;  %v584_v15 = vld [vmem:[%s1014_s5 + $0x38] sm:$0xff] (!%p237_p2) }
   0xd   : > { %s1018_s25 = smov (!%p266_p3, %s720_s25), 1  ;;  %786 = vmatpush1.bf16.msra.mxu0 %v785_v21  ;;  %v327_v46 = vrot.slane %v322_v44, %v326_v43  ;;  %v331_v47 = vrot.slane %v322_v44, %v330_v45  ;;  %v581_v11 = vld [vmem:[%s1014_s5 + $0x20] sm:$0xff]  ;;  %v805_v16 = vpack.c.bf16 %v584_v15, %v583_v14 }
   0xe   : > { %s725_s26 = sshll.u32 %s1018_s25, 3  ;;  %788 = vmatprep.subr.bf16.mxu0 %v787_v22  ;;  %v802_v13 = vpack.c.bf16 %v582_v12, %v581_v11  ;;  %v733_v19 = vld [vmem:[%s1015_s6] ss:$0 sm:$0xff] }
   0xf   : > { %s269_s29 = scalar_lea.vmem %s1009_s0, %s725_s26 }
  0x10   : > { %v893_v0 = vld [vmem:[%s269_s29] sm:$0xff]  ;;  %s273_s29 = scalar_lea.vmem %s1016_s7, %s725_s26 }
  0x11   : > { %v278_v1 = vsel %vm277_vm0, %v893_v0, 0.0  ;;  %790 = vmatpush1.bf16.msra.mxu0 %v789_v27 }
  0x12   : > { %279 = vadd.xlane.f32.xlu0 %v278_v1  ;;  %792 = vmatprep.subr.bf16.mxu0 %v791_v28  ;;  %v836_v1 = vmov 0.0|0.0  }
  0x15   : > { %794 = vmatpush1.bf16.msra.mxu0 %v793_v31 }
  0x16   : > { %750 = vmatprep.subr.mxu0 %v833_v20 }
  0x9f   : > { %v280_v2 = vpop.xlane.xlu0 %279 }
  0xa0   : > { %v282_v3 = vmul.f32 0.015625, %v280_v2 }
  0xa2   : > { %v283_v4 = vsub.f32 %v893_v0, %v282_v3  ;;  %v577_v3 = vld [vmem:[%s1014_s5] sm:$0xff] }
  0xa4   : > { %v284_v5 = vmul.f32 %v283_v4, %v283_v4 }
  0xa6   : > { %v285_v6 = vsel %vm277_vm0, %v284_v5, 0.0 }
  0xa7   : > { %286 = vadd.xlane.f32.xlu0 %v285_v6 }
 0x134   : > { %v287_v32 = vpop.xlane.xlu0 %286 }
 0x135   : > { %v288_v33 = vmul.f32 0.015625, %v287_v32 }
 0x137   : > { %v289_v34 = vadd.f32 1e-05, %v288_v33 }
 0x139   : > { %819 = vrsqrt.f32 %v289_v34 }
 0x143   : > { %v820_v35 = vpop.eup %819 }
 0x144   : > { %v291_v37 = vmul.f32 %v820_v35, %v283_v4  ;;  %v578_v4 = vld [vmem:[%s1014_s5 + $0x8] sm:$0xff] }
 0x145   : > { %v796_v6 = vpack.c.bf16 %v578_v4, %v577_v3 }
 0x146   : > { %v298_v39 = vmul.f32 %v727_v36, %v291_v37 }
 0x148   : > { %v305_v40 = vadd.f32 %v728_v38, %v298_v39 }
 0x14a   : > { %729 = vmatmul.mubr.msk.f32.vlgmr.msra.gmra.mrb[0].mxu0 %vm277_vm0, %v305_v40 }
 0x14b   : > { %752 = vmatprep.mubr.msk.f32.mxu0 %vm834_vm1, %v833_v20 }
 0x21d   : > { %v403_v48 = vpop.f32.mrb[0].mxu0 }
 0x21e   : > { %v404_v49 = vadd.f32 %v403_v48, %v327_v46  ;;  %v405_v50 = vpop.f32.mrb[1].mxu0 }
 0x21f   : > { %v406_v51 = vadd.f32 %v405_v50, %v331_v47 }
 0x220   : > { %414 = vrot.lane.b32.xlu1 %v404_v49, %s835_s28 }
 0x221   : > { %756 = vmatpush3.msra.mxu1 %v406_v51 }
 0x222   : > { %795 = vmatprep.subr.bf16.mxu1 %v836_v1 }
 0x292   : > { %v415_v52 = vpop.permute.xlu1 %414 }
 0x293   : > { %751 = vmatpush3.xpose.msk.msra.mxu0 %vm277_vm0, %v415_v52 }
 0x296   : > { %753 = vmatmul.mubr.msk.f32.vlgmr.msra.gmra.mrb[2].mxu0 %vm277_vm0, %v404_v49 }
 0x369   : > { %v486_v54 = vpop.f32.mrb[2].mxu0 }
 0x36a   : > { %v490_v55 = vmul.f32 0.125, %v486_v54  ;;  %v754_v56 = vpop.f32.mrb[3].mxu0 }
 0x36c   : > { %v491_v57 = vsel %vm412_vm2, %v490_v55, -1e+30 }
 0x36d   : > { %v493_v58 = vsel %vm492_vm3, %v491_v57, -inf }
 0x36e   : > { %494 = vmax.xlane.f32.xlu1 %v493_v58 }
 0x3fb   : > { %v495_v59 = vpop.xlane.xlu1 %494 }
 0x3fc   : > { %v496_v60 = vsub.f32 %v491_v57, %v495_v59 }
 0x3fe   : > { %v497_v61 = vmul.f32 1.442695, %v496_v60 }
 0x400   : > { %821 = vpow2.f32 %v497_v61 }
 0x40a   : > { %v822_v62 = vpop.eup %821 }
 0x40b   : > { %v499_v63 = vsel %vm492_vm3, %v822_v62, 0.0 }
 0x40c   : > { %500 = vadd.xlane.f32.xlu0 %v499_v63 }
 0x499   : > { %v501_v2 = vpop.xlane.xlu0 %500 }
 0x49a   : > { %823 = vrcp.f32 %v501_v2 }
 0x4a4   : > { %v824_v5 = vpop.eup %823 }
 0x4a5   : > { %v503_v7 = vmul.f32 %v824_v5, %v822_v62 }
 0x4a7   : > { %758 = vmatmul.mubr.msk.f32.vlgmr.msra.gmra.mrb[0].mxu1 %vm492_vm3, %v503_v7 }
 0x4a8   : > { %797 = vmatpush3.bf16.msra.mxu1 %v796_v6  ;;  %776 = vmatprep.mubr.msk.f32.mxu1 %vm834_vm1, %v833_v20 }
 0x4a9   : > { %798 = vmatprep.subr.bf16.mxu1 %v836_v1 }
 0x4ac   : > { %800 = vmatpush3.bf16.msra.mxu1 %v799_v10 }
 0x4ad   : > { %801 = vmatprep.subr.bf16.mxu1 %v836_v1 }
 0x4b0   : > { %803 = vmatpush3.bf16.msra.mxu1 %v802_v13 }
 0x4b1   : > { %804 = vmatprep.subr.bf16.mxu1 %v836_v1 }
 0x4b4   : > { %806 = vmatpush3.bf16.msra.mxu1 %v805_v16 }
 0x57a   : > { %v573_v17 = vpop.f32.mrb[0].mxu1 }
 0x57b   : > { %v759_v18 = vpop.f32.mrb[1].mxu1  ;;  %777 = vmatmul.mubr.msk.f32.vlgmr.msra.gmra.mrb[2].mxu1 %vm277_vm0, %v573_v17 }
 0x64e   : > { %v661_v20 = vpop.f32.mrb[2].mxu1 }
 0x64f   : > { %v662_v21 = vadd.f32 %v733_v19, %v661_v20  ;;  %v778_v22 = vpop.f32.mrb[3].mxu1 }
 0x651   : > { %v665_v23 = vadd.f32 %v662_v21, %v893_v0 }
 0x653   : > { %666 = vst.msk [vmem:[%s273_s29] sm:$0xff] %vm277_vm0, %v665_v23 }
 0x654 PF: > { %s17_s24 = sadd.s32 1, %s831_s24  }
 0x655   : > { %p14_p4 = scmp.ge.s32.totalorder %s17_s24, 4  }
 0x657   :  { %16 = sbr.rel (!%p14_p4) target bundleno = 1 (0x1), region = 78 }

</bundles_post_ra>
